<compile_context>
chip_gen: v5e
topology: v5e:2x2
jax: 0.10.0
libtpu: 0.0.40
codegen_flags: <defaults>
</compile_context>

<pallas_src>
import jax
import jax.numpy as jnp
from jax.experimental import pallas as pl
from jax.experimental.pallas import tpu as pltpu


def ensemble_mlp_kernel(x_ref, w1_ref, b1_ref, w2_ref, b2_ref, w3_ref, b3_ref, o_ref):
    x = x_ref[...]                                                        # (B, n_in)
    # layer 1: all heads at once, lane-packed output (B, H*h1), ReLU
    h1 = jnp.dot(x, w1_ref[...], preferred_element_type=jnp.float32) + b1_ref[...]
    h1 = jnp.maximum(h1, 0.0)
    # layer 2: block-diagonal weight keeps heads independent, (B, H*h2), ReLU
    h2 = jnp.dot(h1, w2_ref[...], preferred_element_type=jnp.float32) + b2_ref[...]
    h2 = jnp.maximum(h2, 0.0)
    # output layer: block-diagonal, no activation, (B, H*n_out) lane-dense store
    out = jnp.dot(h2, w3_ref[...], preferred_element_type=jnp.float32) + b3_ref[...]
    o_ref[...] = out.astype(o_ref.dtype)


def _block_diag(w):
    """(H, d_in, d_out) per-head weights -> (H*d_in, H*d_out) block-diagonal."""
    H, di, do = w.shape
    eye = jnp.eye(H, dtype=w.dtype)
    return jnp.einsum('hg,hio->higo', eye, w).reshape(H * di, H * do)


def ensemble_mlp(x, w1, b1, w2, b2, w3, b3):
    """x: (B, n_in); w*: (H, d_in, d_out); b*: (H, 1, d_out). Returns (B, H, n_out)."""
    B, n_in = x.shape
    H, _, h1 = w1.shape
    _, _, h2 = w2.shape
    _, _, n_out = w3.shape

    # One-time layout prep (wrapper side): lane-pack heads.
    w1c = jnp.transpose(w1, (1, 0, 2)).reshape(n_in, H * h1)   # (n_in, H*h1)
    w2bd = _block_diag(w2)                                     # (H*h1, H*h2)
    w3bd = _block_diag(w3)                                     # (H*h2, H*n_out)
    b1c = b1.reshape(1, H * h1)
    b2c = b2.reshape(1, H * h2)
    b3c = b3.reshape(1, H * n_out)

    out_flat = pl.pallas_call(
        ensemble_mlp_kernel,
        out_shape=jax.ShapeDtypeStruct((B, H * n_out), x.dtype),
        # grid=() : single invocation, everything resident in VMEM (total < 100 KiB).
        in_specs=[
            pl.BlockSpec(memory_space=pltpu.MemorySpace.VMEM),  # x
            pl.BlockSpec(memory_space=pltpu.MemorySpace.VMEM),  # w1 concat
            pl.BlockSpec(memory_space=pltpu.MemorySpace.VMEM),  # b1 concat
            pl.BlockSpec(memory_space=pltpu.MemorySpace.VMEM),  # w2 block-diag
            pl.BlockSpec(memory_space=pltpu.MemorySpace.VMEM),  # b2 concat
            pl.BlockSpec(memory_space=pltpu.MemorySpace.VMEM),  # w3 block-diag
            pl.BlockSpec(memory_space=pltpu.MemorySpace.VMEM),  # b3 concat
        ],
        out_specs=pl.BlockSpec(memory_space=pltpu.MemorySpace.VMEM),
    )(x, w1c, b1c, w2bd, b2c, w3bd, b3c)

    # Lane-dense (B, H*n_out) -> (B, H, n_out): a pure reshape (head-major flat
    # layout), exactly matching PyTorch's x.view(batch, n_heads, n_outputs).
    return out_flat.reshape(B, H, n_out)


def _ref_forward(x, w1, b1, w2, b2, w3, b3):
    """Plain-JAX reference of the PyTorch forward."""
    h1 = jnp.maximum(jnp.einsum('bi,hio->hbo', x, w1) + b1, 0.0)
    h2 = jnp.maximum(jnp.einsum('hbi,hio->hbo', h1, w2) + b2, 0.0)
    out = jnp.einsum('hbi,hio->hbo', h2, w3) + b3
    return jnp.transpose(out, (1, 0, 2))


if __name__ == "__main__":
    # Configuration (mirrors EnsembleMLP(n_inputs=16, n_hidden_units=[32, 32],
    #                                     n_outputs=8, n_heads=4))
    B, n_in, H1, H2, n_out, n_heads = 8, 16, 32, 32, 8, 4

    key = jax.random.PRNGKey(0)
    kx, k1, k2, k3, k4, k5, k6 = jax.random.split(key, 7)

    x = jax.random.normal(kx, (B, n_in), dtype=jnp.float32)

    # PyTorch Conv1d(groups=n_heads) weight is (H*d_out, d_in, 1); here stored
    # per-head, pre-transposed so y = x @ w + b.
    w1 = 0.1 * jax.random.normal(k1, (n_heads, n_in, H1), dtype=jnp.float32)
    b1 = 0.1 * jax.random.normal(k2, (n_heads, 1, H1), dtype=jnp.float32)
    w2 = 0.1 * jax.random.normal(k3, (n_heads, H1, H2), dtype=jnp.float32)
    b2 = 0.1 * jax.random.normal(k4, (n_heads, 1, H2), dtype=jnp.float32)
    w3 = 0.1 * jax.random.normal(k5, (n_heads, H2, n_out), dtype=jnp.float32)
    b3 = 0.1 * jax.random.normal(k6, (n_heads, 1, n_out), dtype=jnp.float32)

    out = ensemble_mlp(x, w1, b1, w2, b2, w3, b3)
    out = jax.block_until_ready(out)

    ref = jax.block_until_ready(_ref_forward(x, w1, b1, w2, b2, w3, b3))

    assert out.shape == (B, n_heads, n_out), out.shape
    assert jnp.allclose(out, ref, atol=1e-5, rtol=1e-5), \
        f"max err {jnp.max(jnp.abs(out - ref))}"

    print("KERNEL_OK")
</pallas_src>

<mosaic_0001>
module attributes {stable_mosaic.version = 11 : i64} {
  func.func @ensemble_mlp_kernel(%arg0: memref<8x16xf32, #tpu.memory_space<vmem>>, %arg1: memref<16x128xf32, #tpu.memory_space<vmem>>, %arg2: memref<1x128xf32, #tpu.memory_space<vmem>>, %arg3: memref<128x128xf32, #tpu.memory_space<vmem>>, %arg4: memref<1x128xf32, #tpu.memory_space<vmem>>, %arg5: memref<128x32xf32, #tpu.memory_space<vmem>>, %arg6: memref<1x32xf32, #tpu.memory_space<vmem>>, %arg7: memref<8x32xf32, #tpu.memory_space<vmem>>) attributes {dimension_semantics = [], scalar_prefetch = 0 : i64, scratch_operands = 0 : i64, tpu.core_type = #tpu.core_type<tc>} {
    %c0 = arith.constant 0 : index
    %c0_0 = arith.constant 0 : index
    %0 = vector.load %arg0[%c0, %c0_0] : memref<8x16xf32, #tpu.memory_space<vmem>>, vector<8x16xf32>
    %c0_1 = arith.constant 0 : index
    %c0_2 = arith.constant 0 : index
    %1 = vector.load %arg1[%c0_1, %c0_2] : memref<16x128xf32, #tpu.memory_space<vmem>>, vector<16x128xf32>
    %cst = arith.constant dense<0.000000e+00> : vector<8x128xf32>
    %2 = tpu.matmul %0, %1, %cst {dimension_numbers = #tpu.dot_dimension_numbers<[1], [0], [0], [1], [0, 0, 1, 1], [], []>} : vector<8x16xf32>, vector<16x128xf32>, vector<8x128xf32> -> vector<8x128xf32>
    %c0_3 = arith.constant 0 : index
    %c0_4 = arith.constant 0 : index
    %3 = vector.load %arg2[%c0_3, %c0_4] : memref<1x128xf32, #tpu.memory_space<vmem>>, vector<1x128xf32>
    %4 = vector.broadcast %3 : vector<1x128xf32> to vector<8x128xf32>
    %5 = arith.addf %2, %4 : vector<8x128xf32>
    %cst_5 = arith.constant 0.000000e+00 : f32
    %6 = vector.broadcast %cst_5 : f32 to vector<8x128xf32>
    %7 = arith.maximumf %5, %6 : vector<8x128xf32>
    %c0_6 = arith.constant 0 : index
    %c0_7 = arith.constant 0 : index
    %8 = vector.load %arg3[%c0_6, %c0_7] : memref<128x128xf32, #tpu.memory_space<vmem>>, vector<128x128xf32>
    %cst_8 = arith.constant dense<0.000000e+00> : vector<8x128xf32>
    %9 = tpu.matmul %7, %8, %cst_8 {dimension_numbers = #tpu.dot_dimension_numbers<[1], [0], [0], [1], [0, 0, 1, 1], [], []>} : vector<8x128xf32>, vector<128x128xf32>, vector<8x128xf32> -> vector<8x128xf32>
    %c0_9 = arith.constant 0 : index
    %c0_10 = arith.constant 0 : index
    %10 = vector.load %arg4[%c0_9, %c0_10] : memref<1x128xf32, #tpu.memory_space<vmem>>, vector<1x128xf32>
    %11 = vector.broadcast %10 : vector<1x128xf32> to vector<8x128xf32>
    %12 = arith.addf %9, %11 : vector<8x128xf32>
    %cst_11 = arith.constant 0.000000e+00 : f32
    %13 = vector.broadcast %cst_11 : f32 to vector<8x128xf32>
    %14 = arith.maximumf %12, %13 : vector<8x128xf32>
    %c0_12 = arith.constant 0 : index
    %c0_13 = arith.constant 0 : index
    %15 = vector.load %arg5[%c0_12, %c0_13] : memref<128x32xf32, #tpu.memory_space<vmem>>, vector<128x32xf32>
    %cst_14 = arith.constant dense<0.000000e+00> : vector<8x32xf32>
    %16 = tpu.matmul %14, %15, %cst_14 {dimension_numbers = #tpu.dot_dimension_numbers<[1], [0], [0], [1], [0, 0, 1, 1], [], []>} : vector<8x128xf32>, vector<128x32xf32>, vector<8x32xf32> -> vector<8x32xf32>
    %c0_15 = arith.constant 0 : index
    %c0_16 = arith.constant 0 : index
    %17 = vector.load %arg6[%c0_15, %c0_16] : memref<1x32xf32, #tpu.memory_space<vmem>>, vector<1x32xf32>
    %18 = vector.broadcast %17 : vector<1x32xf32> to vector<8x32xf32>
    %19 = arith.addf %16, %18 : vector<8x32xf32>
    %c0_17 = arith.constant 0 : index
    %c0_18 = arith.constant 0 : index
    %20 = vector.load %arg7[%c0_17, %c0_18] : memref<8x32xf32, #tpu.memory_space<vmem>>, vector<8x32xf32>
    tpu.vector_store %arg7[%c0_17, %c0_18], %19 {strides = array<i32>} : memref<8x32xf32, #tpu.memory_space<vmem>>, vector<8x32xf32>,
    return
  }
}

</mosaic_0001>

<bundles_post_ra>
// kernel: tpu_custom_call.1
= control target key start
LH: loop header
LB: loop body
LE: loop exit
PB: predicated region body
PF: predicated region fallthrough
CT: control target
= control target key end

     0   :  { %vm34_vm0 = vcmask 130048   ;;  %s347_s0 = inlined_call_operand.vmem [shape: f32[8,16], index: 0, kind: input, shape index: {}]   ;;  %s348_s1 = inlined_call_operand.vmem [shape: f32[16,128], index: 1, kind: input, shape index: {}]   ;;  %s349_s2 = inlined_call_operand.vmem [shape: f32[1,128], index: 2, kind: input, shape index: {}]   ;;  %s350_s3 = inlined_call_operand.vmem [shape: f32[128,128], index: 3, kind: input, shape index: {}]   ;;  %s351_s4 = inlined_call_operand.vmem [shape: f32[1,128], index: 4, kind: input, shape index: {}]   ;;  %s352_s5 = inlined_call_operand.vmem [shape: f32[128,32], index: 5, kind: input, shape index: {}]   ;;  %s353_s6 = inlined_call_operand.vmem [shape: f32[1,32], index: 6, kind: input, shape index: {}]   ;;  %s354_s7 = inlined_call_operand.hbm [shape: f32[8,32], index: 7, kind: output, shape index: {}]  }
   0x1   :  { %v29_v0 = vld [vmem:[%s348_s1 + $0x8] sm:$0xff]  ;;  %v28_v1 = vld [vmem:[%s348_s1] sm:$0xff]  ;;  %v74_v3 = vld [vmem:[%s350_s3 + $0x78] sm:$0xff] }
   0x2   :  { %52 = vmatpush.msra.mxu0 %v29_v0  ;;  %v27_v2 = vld [vmem:[%s347_s0] sm:$0xff]  ;;  %v73_v4 = vld [vmem:[%s350_s3 + $0x70] sm:$0xff]  ;;  %79 = vmatpush.msra.mxu1 %v74_v3  ;;  %v72_v5 = vld [vmem:[%s350_s3 + $0x68] sm:$0xff] }
   0x3   :  { %v71_v6 = vld [vmem:[%s350_s3 + $0x60] sm:$0xff] }
   0x4   :  { %53 = vmatpush.msra.mxu0 %v28_v1  ;;  %80 = vmatpush.msra.mxu1 %v73_v4 }
   0x5   :  { %158 = vmatmul.msk.f32.vlgmr.msra.gmra.mxu0 %vm34_vm0, %v27_v2 }
   0x6   :  { %81 = vmatpush.msra.mxu1 %v72_v5 }
   0x7   :  { %12 = vsyncpa [#allocation3], 0  ;;  %v70_v7 = vld [vmem:[%s350_s3 + $0x58] sm:$0xff]  ;;  %v69_v8 = vld [vmem:[%s350_s3 + $0x50] sm:$0xff]  ;;  %s189_s22 = smov [#allocation2]   ;;  %s149_s26 = sshll.u32 %s354_s7, 4  ;;  %s150_s26 = int_to_ptr.hbm [resolvable:$true] %s149_s26 }
   0x8   :  { %82 = vmatpush.msra.mxu1 %v71_v6  ;;  %v68_v9 = vld [vmem:[%s350_s3 + $0x48] sm:$0xff]  ;;  %v67_v10 = vld [vmem:[%s350_s3 + $0x40] sm:$0xff]  ;;  %v66_v11 = vld [vmem:[%s350_s3 + $0x38] sm:$0xff]  ;;  %s147_s23 = sshll.u32 %s189_s22, 4  ;;  %vm140_vm1 = vcmask 261120   ;;  %s148_s23 = int_to_ptr.vmem [resolvable:$true] %s147_s23 }
   0x9   :  { %v65_v12 = vld [vmem:[%s350_s3 + $0x30] sm:$0xff]  ;;  %v64_v13 = vld [vmem:[%s350_s3 + $0x28] sm:$0xff]  ;;  %v63_v14 = vld [vmem:[%s350_s3 + $0x20] sm:$0xff] }
   0xa   :  { %83 = vmatpush.msra.mxu1 %v70_v7  ;;  %v62_v15 = vld [vmem:[%s350_s3 + $0x18] sm:$0xff]  ;;  %v61_v16 = vld [vmem:[%s350_s3 + $0x10] sm:$0xff]  ;;  %v60_v17 = vld [vmem:[%s350_s3 + $0x8] sm:$0xff] }
   0xb   :  { %v59_v18 = vld [vmem:[%s350_s3] sm:$0xff]  ;;  %v115_v19 = vld [vmem:[%s352_s5 + $0x78] sm:$0xff]  ;;  %v114_v20 = vld [vmem:[%s352_s5 + $0x70] sm:$0xff] }
   0xc   :  { %84 = vmatpush.msra.mxu1 %v69_v8  ;;  %120 = vmatpush.msra.mxu2 %v115_v19  ;;  %v113_v21 = vld [vmem:[%s352_s5 + $0x68] sm:$0xff]  ;;  %v112_v22 = vld [vmem:[%s352_s5 + $0x60] sm:$0xff]  ;;  %v111_v23 = vld [vmem:[%s352_s5 + $0x58] sm:$0xff] }
   0xd   :  { %v110_v24 = vld [vmem:[%s352_s5 + $0x50] sm:$0xff]  ;;  %v109_v25 = vld [vmem:[%s352_s5 + $0x48] sm:$0xff]  ;;  %v108_v26 = vld [vmem:[%s352_s5 + $0x40] sm:$0xff] }
   0xe   :  { %85 = vmatpush.msra.mxu1 %v68_v9  ;;  %121 = vmatpush.msra.mxu2 %v114_v20  ;;  %v107_v27 = vld [vmem:[%s352_s5 + $0x38] sm:$0xff]  ;;  %v106_v28 = vld [vmem:[%s352_s5 + $0x30] sm:$0xff]  ;;  %v105_v29 = vld [vmem:[%s352_s5 + $0x28] sm:$0xff] }
   0xf   :  { %v104_v30 = vld [vmem:[%s352_s5 + $0x20] sm:$0xff]  ;;  %v103_v31 = vld [vmem:[%s352_s5 + $0x18] sm:$0xff]  ;;  %v102_v36 = vld [vmem:[%s352_s5 + $0x10] sm:$0xff] }
  0x10   :  { %86 = vmatpush.msra.mxu1 %v67_v10  ;;  %122 = vmatpush.msra.mxu2 %v113_v21  ;;  %v160_v32 = vld [vmem:[%s349_s2] ss:$0 sm:$0xff]  ;;  %v101_v37 = vld [vmem:[%s352_s5 + $0x8] sm:$0xff] }
  0x11   :  { %v100_v38 = vld [vmem:[%s352_s5] sm:$0xff] }
  0x12   :  { %87 = vmatpush.msra.mxu1 %v66_v11  ;;  %123 = vmatpush.msra.mxu2 %v112_v22  ;;  %v161_v39 = vld [vmem:[%s351_s4] ss:$0 sm:$0xff] }
  0x13   :  { %v162_v43 = vld [vmem:[%s353_s6] ss:$0 sm:$0xff] }
  0x14   :  { %88 = vmatpush.msra.mxu1 %v65_v12  ;;  %124 = vmatpush.msra.mxu2 %v111_v23 }
  0x16   :  { %89 = vmatpush.msra.mxu1 %v64_v13  ;;  %125 = vmatpush.msra.mxu2 %v110_v24 }
  0x18   :  { %90 = vmatpush.msra.mxu1 %v63_v14  ;;  %126 = vmatpush.msra.mxu2 %v109_v25 }
  0x1a   :  { %91 = vmatpush.msra.mxu1 %v62_v15  ;;  %127 = vmatpush.msra.mxu2 %v108_v26 }
  0x1c   :  { %92 = vmatpush.msra.mxu1 %v61_v16  ;;  %128 = vmatpush.msra.mxu2 %v107_v27 }
  0x1e   :  { %93 = vmatpush.msra.mxu1 %v60_v17  ;;  %129 = vmatpush.msra.mxu2 %v106_v28 }
  0x20   :  { %94 = vmatpush.msra.mxu1 %v59_v18  ;;  %130 = vmatpush.msra.mxu2 %v105_v29 }
  0x22   :  { %131 = vmatpush.msra.mxu2 %v104_v30 }
  0x24   :  { %132 = vmatpush.msra.mxu2 %v103_v31 }
  0x26   :  { %133 = vmatpush.msra.mxu2 %v102_v36 }
  0x28   :  { %134 = vmatpush.msra.mxu2 %v101_v37 }
  0x2a   :  { %135 = vmatpush.msra.mxu2 %v100_v38 }
  0x82   :  { %v55_v33 = vpop.f32.mrf.mxu0 }
  0x83   :  { %v56_v34 = vadd.f32 %v160_v32, %v55_v33 }
  0x85   :  { %v58_v35 = vmax.f32 %v56_v34, 0.0 }
  0x87   :  { %95 = vmatmul.f32.vlgmr.msra.gmra.mxu1 %v58_v35 }
 0x104   :  { %v96_v40 = vpop.f32.mrf.mxu1 }
 0x105   :  { %v97_v41 = vadd.f32 %v161_v39, %v96_v40 }
 0x107   :  { %v99_v42 = vmax.f32 %v97_v41, 0.0 }
 0x109   :  { %136 = vmatmul.f32.vlgmr.msra.gmra.mxu2 %v99_v42 }
 0x18c   :  { %v137_v44 = vpop.f32.mrf.mxu2 }
 0x18d   :  { %v138_v45 = vadd.f32 %v162_v43, %v137_v44 }
 0x18f   :  { %141 = vst.msk [vmem:[#allocation2] sm:$0xff] %vm140_vm1, %v138_v45 }
 0x190   :  { %152 = dma.vmem_to_hbm [thread:$0]  %s148_s23, 128, %s150_s26, [#allocation3]  }
 0x191   :  { %187 = dma.done.wait [#allocation3], 128  }
 0x192   :  { %188 = vsyncadd [#allocation3], 4294967168 }
 0x193   :  { %157 = vsyncpa [#allocation3], 1 }

</bundles_post_ra>
